<compile_context>
chip_gen: v7x
topology: tpu7x:2x2x1
jax: 0.10.0
libtpu: 0.0.40
codegen_flags: <defaults>
</compile_context>

<pallas_src>
import math
import numpy as np
import jax
import jax.numpy as jnp
from jax.experimental import pallas as pl
from jax.experimental.pallas import tpu as pltpu


# ----------------- DCT basis construction (port of DCTBase.mk_coff) ---------
def _get_1d(ij, uv, N=8):
    return math.cos(math.pi * uv * (ij + 0.5) / N)


def _get_c(u, N=8):
    return math.sqrt(1.0 / N) if u == 0 else math.sqrt(2.0 / N)


def _get_order(src_weight, N=8):
    array_size = N * N
    i = 0
    j = 0
    rearranged = src_weight.copy()
    for k in range(array_size - 1):
        if (i == 0 or i == N - 1) and j % 2 == 0:
            j += 1
        elif (j == 0 or j == N - 1) and i % 2 == 1:
            i += 1
        elif (i + j) % 2 == 1:
            i += 1
            j -= 1
        elif (i + j) % 2 == 0:
            i -= 1
            j += 1
        index = i * N + j
        rearranged[k + 1, ...] = src_weight[index, ...]
    return rearranged


def mk_coff(N=8, rearrange=True):
    dct_weight = np.zeros((N * N, N, N))
    for k in range(N * N):
        u = k // N
        v = k % N
        for i in range(N):
            for j in range(N):
                tmp = _get_1d(i, u, N) * _get_1d(j, v, N)
                tmp *= _get_c(u, N) * _get_c(v, N)
                dct_weight[k, i, j] += tmp
    if rearrange:
        dct_weight = _get_order(dct_weight, N=N)
    return dct_weight


# ----------------------------- Pallas kernel --------------------------------
_TM_MAX = 2048  # max rows (8x8 spatial blocks) per grid step; multiple of 8


def _dct_kernel(x_ref, w_ref, o_ref):
    # x_ref: (tm, 192) VMEM  — flattened patches, column = c*64 + i*8 + j
    # w_ref: (192, 192) VMEM — fused kron(Ycbcr^T, DCT^T) weight (grid-resident)
    # o_ref: (tm, 192) VMEM  — column = c*64 + k   (same ordering as torch)
    o_ref[...] = jnp.dot(x_ref[...], w_ref[...],
                         preferred_element_type=jnp.float32)


def make_dct_forward(dct_weight, ycbcr_matrix, N=8, tm_max=_TM_MAX):
    """Build a jitted function equivalent to DCT.forward for NCHW float32 x."""
    C = 3
    F = N * N
    CF = C * F  # 192

    # fused weight: out[:, c*64+k] = sum_{c',p} M[c,c'] * Wdct[k,p] * x[:, c'*64+p]
    w_np = np.asarray(dct_weight, dtype=np.float32).reshape(F, F)  # [k, p]
    m_np = np.asarray(ycbcr_matrix, dtype=np.float32)              # [c, c']
    w_big_np = np.kron(m_np.T, w_np.T).astype(np.float32)          # (192, 192)

    tm_cap = max(8, (int(tm_max) // 8) * 8)

    @jax.jit
    def forward(x):
        B, Cin, H, W = x.shape
        assert Cin == C and H % N == 0 and W % N == 0
        Hb, Wb = H // N, W // N

        # non-overlapping NxN patches -> [B*Hb*Wb, 3*64], channel-major pixel-minor
        xb = x.reshape(B, C, Hb, N, Wb, N).transpose(0, 2, 4, 1, 3, 5)
        patches = xb.reshape(B * Hb * Wb, CF).astype(jnp.float32)
        Np = patches.shape[0]

        # tile size: whole array if it fits, else a large multiple-of-8 tile
        tm = Np if Np <= tm_cap else tm_cap
        n_rows = pl.cdiv(Np, tm) * tm
        if n_rows != Np:
            # only materialized when rows don't divide the tile
            patches = jnp.pad(patches, ((0, n_rows - Np), (0, 0)))

        w_big = jnp.asarray(w_big_np)  # compile-time constant under jit

        out = pl.pallas_call(
            _dct_kernel,
            out_shape=jax.ShapeDtypeStruct((n_rows, CF), jnp.float32),
            grid=(n_rows // tm,),
            in_specs=[
                pl.BlockSpec((tm, CF), lambda i: (i, 0)),   # patches (lane-dense)
                pl.BlockSpec((CF, CF), lambda i: (0, 0)),   # fused weight (resident)
            ],
            out_specs=pl.BlockSpec((tm, CF), lambda i: (i, 0)),
            compiler_params=pltpu.CompilerParams(
                dimension_semantics=("parallel",)),
        )(patches, w_big)

        # [Np, 3*64] -> [B, 3*64, Hb, Wb]  (channel index = c*64 + k, like torch)
        out = out[:Np].reshape(B, Hb, Wb, CF).transpose(0, 3, 1, 2)
        return out

    return forward


def _reference(x, dct_w, ycbcr, N=8):
    B, C, H, W = x.shape
    m = jnp.asarray(ycbcr, jnp.float32)
    y = jnp.einsum("oc,bchw->bohw", m, x)
    yb = y.reshape(B, C, H // N, N, W // N, N)
    ref = jnp.einsum("kij,bcuivj->bckuv", jnp.asarray(dct_w, jnp.float32), yb)
    return ref.reshape(B, C * N * N, H // N, W // N)


if __name__ == "__main__":
    key = jax.random.PRNGKey(0)
    N = 8
    # deterministic "parameters" exactly as in the module's __init__
    dct_w = mk_coff(N=N)  # (64, 8, 8), zigzag-rearranged
    ycbcr = np.array([[0.299, 0.587, 0.114],
                      [-0.169, -0.331, 0.5],
                      [0.5, -0.419, -0.081]])

    # main small test: single-tile path
    dct_forward = make_dct_forward(dct_w, ycbcr, N=N)
    B, C, H, W = 2, 3, 16, 16
    x = jax.random.normal(key, (B, C, H, W), dtype=jnp.float32)
    out = jax.block_until_ready(dct_forward(x))
    ref = _reference(x, dct_w, ycbcr, N=N)
    assert out.shape == (B, C * N * N, H // N, W // N)
    np.testing.assert_allclose(np.asarray(out), np.asarray(ref), rtol=1e-4, atol=1e-4)

    # second small test: exercise a multi-step pipelined grid (tm=8, 2 steps)
    dct_forward_tiled = make_dct_forward(dct_w, ycbcr, N=N, tm_max=8)
    x2 = jax.random.normal(jax.random.PRNGKey(1), (4, 3, 16, 16), dtype=jnp.float32)
    out2 = jax.block_until_ready(dct_forward_tiled(x2))
    ref2 = _reference(x2, dct_w, ycbcr, N=N)
    np.testing.assert_allclose(np.asarray(out2), np.asarray(ref2), rtol=1e-4, atol=1e-4)

    print("KERNEL_OK")
</pallas_src>

<mosaic_0001>
module attributes {stable_mosaic.version = 11 : i64} {
  func.func @_dct_kernel(%arg0: i32, %arg1: memref<8x192xf32, #tpu.memory_space<vmem>>, %arg2: memref<192x192xf32, #tpu.memory_space<vmem>>, %arg3: memref<8x192xf32, #tpu.memory_space<vmem>>) attributes {dimension_semantics = [#tpu.dimension_semantics<parallel>], iteration_bounds = array<i64: 1>, scalar_prefetch = 0 : i64, scratch_operands = 0 : i64, tpu.core_type = #tpu.core_type<tc>, window_params = [{transform_indices = @transform_0, window_bounds = array<i64: 8, 192>}, {pipeline_mode = #tpu.pipeline_mode<synchronous>, transform_indices = @transform_1, window_bounds = array<i64: 192, 192>}, {transform_indices = @transform_2, window_bounds = array<i64: 8, 192>}]} {
    %c0 = arith.constant 0 : index
    %c0_0 = arith.constant 0 : index
    %0 = vector.load %arg1[%c0, %c0_0] : memref<8x192xf32, #tpu.memory_space<vmem>>, vector<8x192xf32>
    %c0_1 = arith.constant 0 : index
    %c0_2 = arith.constant 0 : index
    %1 = vector.load %arg2[%c0_1, %c0_2] : memref<192x192xf32, #tpu.memory_space<vmem>>, vector<192x192xf32>
    %cst = arith.constant dense<0.000000e+00> : vector<8x192xf32>
    %2 = tpu.matmul %0, %1, %cst {dimension_numbers = #tpu.dot_dimension_numbers<[1], [0], [0], [1], [0, 0, 1, 1], [], []>} : vector<8x192xf32>, vector<192x192xf32>, vector<8x192xf32> -> vector<8x192xf32>
    %c0_3 = arith.constant 0 : index
    %c0_4 = arith.constant 0 : index
    %3 = vector.load %arg3[%c0_3, %c0_4] : memref<8x192xf32, #tpu.memory_space<vmem>>, vector<8x192xf32>
    tpu.vector_store %arg3[%c0_3, %c0_4], %2 {strides = array<i32>} : memref<8x192xf32, #tpu.memory_space<vmem>>, vector<8x192xf32>,
    return
  }
  func.func @transform_0(%arg0: i32) -> (i32, i32) {
    %c0_i32 = arith.constant 0 : i32
    %c0_i32_0 = arith.constant 0 : i32
    return %arg0, %c0_i32 : i32, i32
  }
  func.func @transform_1(%arg0: i32) -> (i32, i32) {
    %c0_i32 = arith.constant 0 : i32
    %c0_i32_0 = arith.constant 0 : i32
    %c0_i32_1 = arith.constant 0 : i32
    return %c0_i32, %c0_i32_0 : i32, i32
  }
  func.func @transform_2(%arg0: i32) -> (i32, i32) {
    %c0_i32 = arith.constant 0 : i32
    %c0_i32_0 = arith.constant 0 : i32
    return %arg0, %c0_i32 : i32, i32
  }
}

</mosaic_0001>

<bundles_post_ra>
// kernel: forward.1
= control target key start
LH: loop header
LB: loop body
LE: loop exit
PB: predicated region body
PF: predicated region fallthrough
CT: control target
= control target key end

     0   :  { %vm61_vm0 = vcmask 523264   ;;  %s364_s1 = inlined_call_operand.vmem [shape: f32[192,192], index: 1, kind: input, shape index: {}]   ;;  %s365_s0 = inlined_call_operand.vmem [shape: f32[8,192], index: 0, kind: input, shape index: {}]   ;;  %s366_s2 = inlined_call_operand.vmem [shape: f32[8,192], index: 2, kind: output, shape index: {}]  }
   0x1   :  { %v14_v0 = vld [vmem:[%s364_s1 + $0x8] sm:$0xff]  ;;  %v16_v1 = vld [vmem:[%s364_s1 + $0x18] sm:$0xff]  ;;  %v13_v2 = vld [vmem:[%s364_s1] sm:$0xff] }
   0x2   :  { %v143_v3 = vpack.c.bf16 %v16_v1, %v14_v0  ;;  %v15_v4 = vld [vmem:[%s364_s1 + $0x10] sm:$0xff]  ;;  %v18_v5 = vld [vmem:[%s364_s1 + $0x28] sm:$0xff]  ;;  %v20_v6 = vld [vmem:[%s364_s1 + $0x38] sm:$0xff] }
   0x3   :  { %v145_v7 = vpack.c.bf16 %v15_v4, %v13_v2  ;;  %v147_v8 = vpack.c.bf16 %v20_v6, %v18_v5  ;;  %v17_v9 = vld [vmem:[%s364_s1 + $0x20] sm:$0xff]  ;;  %v19_v10 = vld [vmem:[%s364_s1 + $0x30] sm:$0xff]  ;;  %v22_v11 = vld [vmem:[%s364_s1 + $0x48] sm:$0xff] }
   0x4   :  { %144 = vmatprep.subr.bf16.mxu0 %v143_v3  ;;  %v24_v12 = vld [vmem:[%s364_s1 + $0x58] sm:$0xff]  ;;  %v149_v13 = vpack.c.bf16 %v19_v10, %v17_v9  ;;  %v21_v15 = vld [vmem:[%s364_s1 + $0x40] sm:$0xff]  ;;  %v23_v16 = vld [vmem:[%s364_s1 + $0x50] sm:$0xff] }
   0x5   :  { %146 = vmatpush1.bf16.msra.mxu0 %v145_v7  ;;  %v151_v14 = vpack.c.bf16 %v24_v12, %v22_v11  ;;  %v26_v17 = vld [vmem:[%s364_s1 + $0x68] sm:$0xff]  ;;  %v28_v18 = vld [vmem:[%s364_s1 + $0x78] sm:$0xff]  ;;  %v153_v19 = vpack.c.bf16 %v23_v16, %v21_v15  ;;  %v25_v21 = vld [vmem:[%s364_s1 + $0x60] sm:$0xff] }
   0x6   :  { %148 = vmatprep.subr.bf16.mxu0 %v147_v8  ;;  %v155_v20 = vpack.c.bf16 %v28_v18, %v26_v17  ;;  %v27_v22 = vld [vmem:[%s364_s1 + $0x70] sm:$0xff]  ;;  %v30_v23 = vld [vmem:[%s364_s1 + $0x88] sm:$0xff]  ;;  %v32_v24 = vld [vmem:[%s364_s1 + $0x98] sm:$0xff] }
   0x7   :  { %v157_v25 = vpack.c.bf16 %v27_v22, %v25_v21  ;;  %v159_v26 = vpack.c.bf16 %v32_v24, %v30_v23  ;;  %v29_v27 = vld [vmem:[%s364_s1 + $0x80] sm:$0xff]  ;;  %v31_v28 = vld [vmem:[%s364_s1 + $0x90] sm:$0xff]  ;;  %v34_v29 = vld [vmem:[%s364_s1 + $0xa8] sm:$0xff] }
   0x8   :  { %v36_v30 = vld [vmem:[%s364_s1 + $0xb8] sm:$0xff]  ;;  %v161_v31 = vpack.c.bf16 %v31_v28, %v29_v27  ;;  %v12_v32 = vld [vmem:[%s365_s0 + $0x8] sm:$0xff]  ;;  %v33_v34 = vld [vmem:[%s364_s1 + $0xa0] sm:$0xff] }
   0x9   :  { %150 = vmatpush1.bf16.msra.mxu0 %v149_v13  ;;  %v163_v33 = vpack.c.bf16 %v36_v30, %v34_v29  ;;  %v35_v35 = vld [vmem:[%s364_s1 + $0xb0] sm:$0xff]  ;;  %142 = vmatprep.mubr.msk.f32.mxu0 %vm61_vm0, %v12_v32  ;;  %v38_v36 = vld [vmem:[%s364_s1 + $0xc8] sm:$0xff]  ;;  %v40_v37 = vld [vmem:[%s364_s1 + $0xd8] sm:$0xff] }
   0xa   :  { %152 = vmatprep.subr.bf16.mxu0 %v151_v14  ;;  %v165_v38 = vpack.c.bf16 %v35_v35, %v33_v34  ;;  %v167_v39 = vpack.c.bf16 %v40_v37, %v38_v36  ;;  %v37_v40 = vld [vmem:[%s364_s1 + $0xc0] sm:$0xff]  ;;  %v39_v41 = vld [vmem:[%s364_s1 + $0xd0] sm:$0xff]  ;;  %v42_v42 = vld [vmem:[%s364_s1 + $0xe8] sm:$0xff] }
   0xb   :  { %v44_v43 = vld [vmem:[%s364_s1 + $0xf8] sm:$0xff]  ;;  %v169_v44 = vpack.c.bf16 %v39_v41, %v37_v40  ;;  %v41_v46 = vld [vmem:[%s364_s1 + $0xe0] sm:$0xff]  ;;  %v43_v47 = vld [vmem:[%s364_s1 + $0xf0] sm:$0xff] }
   0xc   :  { %v171_v45 = vpack.c.bf16 %v44_v43, %v42_v42  ;;  %v46_v48 = vld [vmem:[%s364_s1 + $0x108] sm:$0xff]  ;;  %v48_v49 = vld [vmem:[%s364_s1 + $0x118] sm:$0xff]  ;;  %v173_v50 = vpack.c.bf16 %v43_v47, %v41_v46  ;;  %v45_v52 = vld [vmem:[%s364_s1 + $0x100] sm:$0xff] }
   0xd   :  { %154 = vmatpush1.bf16.msra.mxu0 %v153_v19  ;;  %v175_v51 = vpack.c.bf16 %v48_v49, %v46_v48  ;;  %v47_v53 = vld [vmem:[%s364_s1 + $0x110] sm:$0xff]  ;;  %v50_v54 = vld [vmem:[%s364_s1 + $0x128] sm:$0xff]  ;;  %v52_v55 = vld [vmem:[%s364_s1 + $0x138] sm:$0xff] }
   0xe   :  { %156 = vmatprep.subr.bf16.mxu0 %v155_v20  ;;  %v177_v56 = vpack.c.bf16 %v47_v53, %v45_v52  ;;  %v179_v57 = vpack.c.bf16 %v52_v55, %v50_v54  ;;  %v49_v58 = vld [vmem:[%s364_s1 + $0x120] sm:$0xff]  ;;  %v51_v59 = vld [vmem:[%s364_s1 + $0x130] sm:$0xff]  ;;  %v54_v60 = vld [vmem:[%s364_s1 + $0x148] sm:$0xff] }
   0xf   :  { %v56_v61 = vld [vmem:[%s364_s1 + $0x158] sm:$0xff]  ;;  %v181_v62 = vpack.c.bf16 %v51_v59, %v49_v58  ;;  %v53_v0 = vld [vmem:[%s364_s1 + $0x140] sm:$0xff]  ;;  %v55_v1 = vld [vmem:[%s364_s1 + $0x150] sm:$0xff] }
  0x10   :  { %v183_v63 = vpack.c.bf16 %v56_v61, %v54_v60  ;;  %v58_v2 = vld [vmem:[%s364_s1 + $0x168] sm:$0xff]  ;;  %v60_v3 = vld [vmem:[%s364_s1 + $0x178] sm:$0xff]  ;;  %v185_v4 = vpack.c.bf16 %v55_v1, %v53_v0  ;;  %v57_v6 = vld [vmem:[%s364_s1 + $0x160] sm:$0xff] }
  0x11   :  { %158 = vmatpush1.bf16.msra.mxu0 %v157_v25  ;;  %v187_v5 = vpack.c.bf16 %v60_v3, %v58_v2  ;;  %v59_v7 = vld [vmem:[%s364_s1 + $0x170] sm:$0xff]  ;;  %v11_v9 = vld [vmem:[%s365_s0] sm:$0xff] }
  0x12   :  { %160 = vmatprep.subr.bf16.mxu0 %v159_v26  ;;  %v189_v8 = vpack.c.bf16 %v59_v7, %v57_v6 }
  0x15   :  { %162 = vmatpush1.bf16.msra.mxu0 %v161_v31 }
  0x16   :  { %164 = vmatprep.subr.bf16.mxu0 %v163_v33 }
  0x19   :  { %166 = vmatpush1.bf16.msra.mxu0 %v165_v38 }
  0x1a   :  { %168 = vmatprep.subr.bf16.mxu0 %v167_v39 }
  0x1d   :  { %170 = vmatpush1.bf16.msra.mxu0 %v169_v44 }
  0x1e   :  { %172 = vmatprep.subr.bf16.mxu0 %v171_v45 }
  0x21   :  { %174 = vmatpush1.bf16.msra.mxu0 %v173_v50 }
  0x22   :  { %176 = vmatprep.subr.bf16.mxu0 %v175_v51 }
  0x25   :  { %178 = vmatpush1.bf16.msra.mxu0 %v177_v56 }
  0x26   :  { %180 = vmatprep.subr.bf16.mxu0 %v179_v57 }
  0x29   :  { %182 = vmatpush1.bf16.msra.mxu0 %v181_v62 }
  0x2a   :  { %184 = vmatprep.subr.bf16.mxu0 %v183_v63 }
  0x2d   :  { %186 = vmatpush1.bf16.msra.mxu0 %v185_v4 }
  0x2e   :  { %188 = vmatprep.subr.bf16.mxu0 %v187_v5 }
  0x31   :  { %190 = vmatpush1.bf16.msra.mxu0 %v189_v8 }
  0x34   :  { %130 = vmatmul.mubr.f32.vlgmr.msra.gmra.mrb[0].mxu0 %v11_v9 }
 0x107   :  { %v131_v10 = vpop.f32.mrb[0].mxu0 }
 0x108   :  { %136 = vst [vmem:[%s366_s2] sm:$0xff] %v131_v10  ;;  %v133_v11 = vpop.f32.mrb[1].mxu0 }
 0x109   :  { %137 = vst.msk [vmem:[%s366_s2 + $0x8] sm:$0xff] %vm61_vm0, %v133_v11 }

</bundles_post_ra>
